<compile_context>
chip_gen: v6e
topology: v6e:2x2x1
jax: 0.10.0
libtpu: 0.0.40
codegen_flags: <defaults>
</compile_context>

<pallas_src>
import functools

import jax
import jax.numpy as jnp
from jax.experimental import pallas as pl
from jax.experimental.pallas import tpu as pltpu


def _triplet_encode_kernel(q_ref, p_ref, n_ref, w_ref, b_ref,
                           qo_ref, po_ref, no_ref, *, mxu_dtype):
    """y_i = x_i @ W (+ bias at finalize); out_i = y_i / max(||y_i||_2, 1e-12)."""
    k = pl.program_id(1)
    nk = pl.num_programs(1)

    @pl.when(k == 0)
    def _init():
        qo_ref[...] = jnp.zeros_like(qo_ref)
        po_ref[...] = jnp.zeros_like(po_ref)
        no_ref[...] = jnp.zeros_like(no_ref)

    # bf16 MXU operands (v5e/v6e/v7x MXU are all bf16-native); f32 accumulate.
    w = w_ref[...].astype(mxu_dtype)
    qo_ref[...] += jnp.dot(q_ref[...].astype(mxu_dtype), w,
                           preferred_element_type=jnp.float32)
    po_ref[...] += jnp.dot(p_ref[...].astype(mxu_dtype), w,
                           preferred_element_type=jnp.float32)
    no_ref[...] += jnp.dot(n_ref[...].astype(mxu_dtype), w,
                           preferred_element_type=jnp.float32)

    @pl.when(k == nk - 1)
    def _finalize():
        b = b_ref[...]                                   # (1, Dout) f32
        for out_ref in (qo_ref, po_ref, no_ref):
            y = out_ref[...] + b                         # f32 epilogue
            nrm = jnp.sqrt(jnp.sum(y * y, axis=-1, keepdims=True))
            out_ref[...] = y / jnp.maximum(nrm, 1e-12)   # == F.normalize


def triplet_ranker(queries, positives, negatives, weight, bias,
                   *, mxu_dtype=jnp.bfloat16, block_m=128, block_k=512):
    """Pallas TripletRanker.forward with a Linear encoder.

    queries/positives/negatives: (B, Din) float32
    weight: (Din, Dout) float32   (already transposed vs. torch's (Dout, Din))
    bias:   (Dout,)     float32
    Returns three (B, Dout) L2-normalized encodings.
    """
    B, Din = queries.shape
    Dout = weight.shape[1]
    b2 = bias.reshape(1, Dout).astype(jnp.float32)

    # Tile sizes: batch tiled at block_m rows (parallel axis); Din tiled at
    # block_k only when it divides evenly, otherwise kept whole (single K step).
    tm = B if B <= block_m else block_m
    tk = block_k if (Din > block_k and Din % block_k == 0) else Din
    grid = (pl.cdiv(B, tm), pl.cdiv(Din, tk))

    x_spec = pl.BlockSpec((tm, tk), lambda i, k: (i, k))
    w_spec = pl.BlockSpec((tk, Dout), lambda i, k: (k, 0))
    b_spec = pl.BlockSpec((1, Dout), lambda i, k: (0, 0))
    o_spec = pl.BlockSpec((tm, Dout), lambda i, k: (i, 0))   # resident across K

    # VMEM budget (double-buffered inputs/outputs) + headroom; keeps the same
    # config valid on v7x's smaller VMEM while allowing large tiles elsewhere.
    vmem_bytes = (2 * (3 * tm * tk + tk * Dout + Dout) * 4
                  + 2 * 3 * tm * Dout * 4)
    vmem_limit = int(min(max(2 * vmem_bytes, 4 << 20), 100 << 20))

    kernel = functools.partial(_triplet_encode_kernel, mxu_dtype=mxu_dtype)

    return pl.pallas_call(
        kernel,
        out_shape=tuple(
            jax.ShapeDtypeStruct((B, Dout), jnp.float32) for _ in range(3)
        ),
        grid=grid,
        in_specs=[x_spec, x_spec, x_spec, w_spec, b_spec],
        out_specs=(o_spec, o_spec, o_spec),
        compiler_params=pltpu.CompilerParams(
            dimension_semantics=("parallel", "arbitrary"),
            vmem_limit_bytes=vmem_limit,
        ),
    )(queries, positives, negatives, weight, b2)


if __name__ == "__main__":
    B, Din, Dout = 8, 32, 128

    key = jax.random.PRNGKey(0)
    kq, kp, kn, kw, kb = jax.random.split(key, 5)

    queries = jax.random.normal(kq, (B, Din), dtype=jnp.float32)
    positives = jax.random.normal(kp, (B, Din), dtype=jnp.float32)
    negatives = jax.random.normal(kn, (B, Din), dtype=jnp.float32)

    # Deterministic Linear params (mimics torch.nn.Linear uniform +/- 1/sqrt(Din)).
    bound = 1.0 / jnp.sqrt(jnp.float32(Din))
    weight = jax.random.uniform(kw, (Din, Dout), jnp.float32, -bound, bound)
    bias = jax.random.uniform(kb, (Dout,), jnp.float32, -bound, bound)

    # Plain-JAX f32 reference (matches torch nn.functional.normalize semantics).
    def ref_encode(x):
        y = x @ weight + bias
        nrm = jnp.maximum(jnp.linalg.norm(y, axis=-1, keepdims=True), 1e-12)
        return y / nrm

    ref = (ref_encode(queries), ref_encode(positives), ref_encode(negatives))

    # 1) Exact-semantics check: f32 MXU operands, tight tolerance.
    outs_f32 = triplet_ranker(queries, positives, negatives, weight, bias,
                              mxu_dtype=jnp.float32)
    jax.block_until_ready(outs_f32)
    for got, want in zip(outs_f32, ref):
        assert jnp.allclose(got, want, atol=1e-5, rtol=1e-5)

    # 2) Default fast path: bf16 MXU operands (v6e/v7x-native), looser tolerance.
    outs_bf16 = triplet_ranker(queries, positives, negatives, weight, bias)
    jax.block_until_ready(outs_bf16)
    for got, want in zip(outs_bf16, ref):
        assert jnp.allclose(got, want, atol=2e-2, rtol=2e-2)
        # Outputs must be unit-norm regardless of MXU precision.
        assert jnp.allclose(jnp.linalg.norm(got, axis=-1), 1.0, atol=1e-4)

    print("KERNEL_OK")
</pallas_src>

<mosaic_0001>
module attributes {stable_mosaic.version = 11 : i64} {
  func.func @_triplet_encode_kernel(%arg0: i32, %arg1: i32, %arg2: memref<8x32xf32, #tpu.memory_space<vmem>>, %arg3: memref<8x32xf32, #tpu.memory_space<vmem>>, %arg4: memref<8x32xf32, #tpu.memory_space<vmem>>, %arg5: memref<32x128xf32, #tpu.memory_space<vmem>>, %arg6: memref<1x128xf32, #tpu.memory_space<vmem>>, %arg7: memref<8x128xf32, #tpu.memory_space<vmem>>, %arg8: memref<8x128xf32, #tpu.memory_space<vmem>>, %arg9: memref<8x128xf32, #tpu.memory_space<vmem>>) attributes {dimension_semantics = [#tpu.dimension_semantics<parallel>, #tpu.dimension_semantics<arbitrary>], iteration_bounds = array<i64: 1, 1>, scalar_prefetch = 0 : i64, scratch_operands = 0 : i64, tpu.core_type = #tpu.core_type<tc>, window_params = [{transform_indices = @transform_0, window_bounds = array<i64: 8, 32>}, {transform_indices = @transform_1, window_bounds = array<i64: 8, 32>}, {transform_indices = @transform_2, window_bounds = array<i64: 8, 32>}, {transform_indices = @transform_3, window_bounds = array<i64: 32, 128>}, {pipeline_mode = #tpu.pipeline_mode<synchronous>, transform_indices = @transform_4, window_bounds = array<i64: 1, 128>}, {transform_indices = @transform_5, window_bounds = array<i64: 8, 128>}, {transform_indices = @transform_6, window_bounds = array<i64: 8, 128>}, {transform_indices = @transform_7, window_bounds = array<i64: 8, 128>}]} {
    %c0_i32 = arith.constant 0 : i32
    %0 = arith.cmpi eq, %arg1, %c0_i32 : i32
    %1 = arith.extui %0 : i1 to i32
    %c0_i32_0 = arith.constant 0 : i32
    %2 = arith.cmpi ne, %1, %c0_i32_0 : i32
    scf.if %2 {
      %cst_24 = arith.constant 0.000000e+00 : f32
      %22 = vector.broadcast %cst_24 : f32 to vector<8x128xf32>
      %c0_25 = arith.constant 0 : index
      %c0_26 = arith.constant 0 : index
      %23 = vector.load %arg7[%c0_25, %c0_26] : memref<8x128xf32, #tpu.memory_space<vmem>>, vector<8x128xf32>
      tpu.vector_store %arg7[%c0_25, %c0_26], %22 {strides = array<i32>} : memref<8x128xf32, #tpu.memory_space<vmem>>, vector<8x128xf32>,
      %cst_27 = arith.constant 0.000000e+00 : f32
      %24 = vector.broadcast %cst_27 : f32 to vector<8x128xf32>
      %c0_28 = arith.constant 0 : index
      %c0_29 = arith.constant 0 : index
      %25 = vector.load %arg8[%c0_28, %c0_29] : memref<8x128xf32, #tpu.memory_space<vmem>>, vector<8x128xf32>
      tpu.vector_store %arg8[%c0_28, %c0_29], %24 {strides = array<i32>} : memref<8x128xf32, #tpu.memory_space<vmem>>, vector<8x128xf32>,
      %cst_30 = arith.constant 0.000000e+00 : f32
      %26 = vector.broadcast %cst_30 : f32 to vector<8x128xf32>
      %c0_31 = arith.constant 0 : index
      %c0_32 = arith.constant 0 : index
      %27 = vector.load %arg9[%c0_31, %c0_32] : memref<8x128xf32, #tpu.memory_space<vmem>>, vector<8x128xf32>
      tpu.vector_store %arg9[%c0_31, %c0_32], %26 {strides = array<i32>} : memref<8x128xf32, #tpu.memory_space<vmem>>, vector<8x128xf32>,
    } else {
    }
    %c0 = arith.constant 0 : index
    %c0_1 = arith.constant 0 : index
    %3 = vector.load %arg5[%c0, %c0_1] : memref<32x128xf32, #tpu.memory_space<vmem>>, vector<32x128xf32>
    %c0_2 = arith.constant 0 : index
    %c0_3 = arith.constant 0 : index
    %4 = vector.load %arg7[%c0_2, %c0_3] : memref<8x128xf32, #tpu.memory_space<vmem>>, vector<8x128xf32>
    %c0_4 = arith.constant 0 : index
    %c0_5 = arith.constant 0 : index
    %5 = vector.load %arg2[%c0_4, %c0_5] : memref<8x32xf32, #tpu.memory_space<vmem>>, vector<8x32xf32>
    %cst = arith.constant dense<0.000000e+00> : vector<8x128xf32>
    %6 = tpu.matmul %5, %3, %cst {dimension_numbers = #tpu.dot_dimension_numbers<[1], [0], [0], [1], [0, 0, 1, 1], [], []>} : vector<8x32xf32>, vector<32x128xf32>, vector<8x128xf32> -> vector<8x128xf32>
    %7 = arith.addf %4, %6 : vector<8x128xf32>
    %c0_6 = arith.constant 0 : index
    %c0_7 = arith.constant 0 : index
    %8 = vector.load %arg7[%c0_6, %c0_7] : memref<8x128xf32, #tpu.memory_space<vmem>>, vector<8x128xf32>
    tpu.vector_store %arg7[%c0_6, %c0_7], %7 {strides = array<i32>} : memref<8x128xf32, #tpu.memory_space<vmem>>, vector<8x128xf32>,
    %c0_8 = arith.constant 0 : index
    %c0_9 = arith.constant 0 : index
    %9 = vector.load %arg8[%c0_8, %c0_9] : memref<8x128xf32, #tpu.memory_space<vmem>>, vector<8x128xf32>
    %c0_10 = arith.constant 0 : index
    %c0_11 = arith.constant 0 : index
    %10 = vector.load %arg3[%c0_10, %c0_11] : memref<8x32xf32, #tpu.memory_space<vmem>>, vector<8x32xf32>
    %cst_12 = arith.constant dense<0.000000e+00> : vector<8x128xf32>
    %11 = tpu.matmul %10, %3, %cst_12 {dimension_numbers = #tpu.dot_dimension_numbers<[1], [0], [0], [1], [0, 0, 1, 1], [], []>} : vector<8x32xf32>, vector<32x128xf32>, vector<8x128xf32> -> vector<8x128xf32>
    %12 = arith.addf %9, %11 : vector<8x128xf32>
    %c0_13 = arith.constant 0 : index
    %c0_14 = arith.constant 0 : index
    %13 = vector.load %arg8[%c0_13, %c0_14] : memref<8x128xf32, #tpu.memory_space<vmem>>, vector<8x128xf32>
    tpu.vector_store %arg8[%c0_13, %c0_14], %12 {strides = array<i32>} : memref<8x128xf32, #tpu.memory_space<vmem>>, vector<8x128xf32>,
    %c0_15 = arith.constant 0 : index
    %c0_16 = arith.constant 0 : index
    %14 = vector.load %arg9[%c0_15, %c0_16] : memref<8x128xf32, #tpu.memory_space<vmem>>, vector<8x128xf32>
    %c0_17 = arith.constant 0 : index
    %c0_18 = arith.constant 0 : index
    %15 = vector.load %arg4[%c0_17, %c0_18] : memref<8x32xf32, #tpu.memory_space<vmem>>, vector<8x32xf32>
    %cst_19 = arith.constant dense<0.000000e+00> : vector<8x128xf32>
    %16 = tpu.matmul %15, %3, %cst_19 {dimension_numbers = #tpu.dot_dimension_numbers<[1], [0], [0], [1], [0, 0, 1, 1], [], []>} : vector<8x32xf32>, vector<32x128xf32>, vector<8x128xf32> -> vector<8x128xf32>
    %17 = arith.addf %14, %16 : vector<8x128xf32>
    %c0_20 = arith.constant 0 : index
    %c0_21 = arith.constant 0 : index
    %18 = vector.load %arg9[%c0_20, %c0_21] : memref<8x128xf32, #tpu.memory_space<vmem>>, vector<8x128xf32>
    tpu.vector_store %arg9[%c0_20, %c0_21], %17 {strides = array<i32>} : memref<8x128xf32, #tpu.memory_space<vmem>>, vector<8x128xf32>,
    %c0_i32_22 = arith.constant 0 : i32
    %19 = arith.cmpi eq, %arg1, %c0_i32_22 : i32
    %20 = arith.extui %19 : i1 to i32
    %c0_i32_23 = arith.constant 0 : i32
    %21 = arith.cmpi ne, %20, %c0_i32_23 : i32
    scf.if %21 {
      %c0_24 = arith.constant 0 : index
      %c0_25 = arith.constant 0 : index
      %22 = vector.load %arg6[%c0_24, %c0_25] : memref<1x128xf32, #tpu.memory_space<vmem>>, vector<1x128xf32>
      %c0_26 = arith.constant 0 : index
      %c0_27 = arith.constant 0 : index
      %23 = vector.load %arg7[%c0_26, %c0_27] : memref<8x128xf32, #tpu.memory_space<vmem>>, vector<8x128xf32>
      %24 = vector.broadcast %22 : vector<1x128xf32> to vector<8x128xf32>
      %25 = arith.addf %23, %24 : vector<8x128xf32>
      %26 = arith.mulf %25, %25 : vector<8x128xf32>
      %cst_28 = arith.constant dense<0.000000e+00> : vector<8xf32>
      %27 = vector.multi_reduction <add>, %26, %cst_28 [1] : vector<8x128xf32> to vector<8xf32>
      %28 = vector.shape_cast %27 : vector<8xf32> to vector<8x1xf32>
      %29 = math.sqrt %28 : vector<8x1xf32>
      %cst_29 = arith.constant 9.99999996E-13 : f32
      %30 = vector.broadcast %cst_29 : f32 to vector<8x1xf32>
      %31 = arith.maximumf %29, %30 : vector<8x1xf32>
      %32 = vector.broadcast %31 : vector<8x1xf32> to vector<8x128xf32>
      %33 = arith.divf %25, %32 : vector<8x128xf32>
      %c0_30 = arith.constant 0 : index
      %c0_31 = arith.constant 0 : index
      %34 = vector.load %arg7[%c0_30, %c0_31] : memref<8x128xf32, #tpu.memory_space<vmem>>, vector<8x128xf32>
      tpu.vector_store %arg7[%c0_30, %c0_31], %33 {strides = array<i32>} : memref<8x128xf32, #tpu.memory_space<vmem>>, vector<8x128xf32>,
      %c0_32 = arith.constant 0 : index
      %c0_33 = arith.constant 0 : index
      %35 = vector.load %arg8[%c0_32, %c0_33] : memref<8x128xf32, #tpu.memory_space<vmem>>, vector<8x128xf32>
      %36 = vector.broadcast %22 : vector<1x128xf32> to vector<8x128xf32>
      %37 = arith.addf %35, %36 : vector<8x128xf32>
      %38 = arith.mulf %37, %37 : vector<8x128xf32>
      %cst_34 = arith.constant dense<0.000000e+00> : vector<8xf32>
      %39 = vector.multi_reduction <add>, %38, %cst_34 [1] : vector<8x128xf32> to vector<8xf32>
      %40 = vector.shape_cast %39 : vector<8xf32> to vector<8x1xf32>
      %41 = math.sqrt %40 : vector<8x1xf32>
      %cst_35 = arith.constant 9.99999996E-13 : f32
      %42 = vector.broadcast %cst_35 : f32 to vector<8x1xf32>
      %43 = arith.maximumf %41, %42 : vector<8x1xf32>
      %44 = vector.broadcast %43 : vector<8x1xf32> to vector<8x128xf32>
      %45 = arith.divf %37, %44 : vector<8x128xf32>
      %c0_36 = arith.constant 0 : index
      %c0_37 = arith.constant 0 : index
      %46 = vector.load %arg8[%c0_36, %c0_37] : memref<8x128xf32, #tpu.memory_space<vmem>>, vector<8x128xf32>
      tpu.vector_store %arg8[%c0_36, %c0_37], %45 {strides = array<i32>} : memref<8x128xf32, #tpu.memory_space<vmem>>, vector<8x128xf32>,
      %c0_38 = arith.constant 0 : index
      %c0_39 = arith.constant 0 : index
      %47 = vector.load %arg9[%c0_38, %c0_39] : memref<8x128xf32, #tpu.memory_space<vmem>>, vector<8x128xf32>
      %48 = vector.broadcast %22 : vector<1x128xf32> to vector<8x128xf32>
      %49 = arith.addf %47, %48 : vector<8x128xf32>
      %50 = arith.mulf %49, %49 : vector<8x128xf32>
      %cst_40 = arith.constant dense<0.000000e+00> : vector<8xf32>
      %51 = vector.multi_reduction <add>, %50, %cst_40 [1] : vector<8x128xf32> to vector<8xf32>
      %52 = vector.shape_cast %51 : vector<8xf32> to vector<8x1xf32>
      %53 = math.sqrt %52 : vector<8x1xf32>
      %cst_41 = arith.constant 9.99999996E-13 : f32
      %54 = vector.broadcast %cst_41 : f32 to vector<8x1xf32>
      %55 = arith.maximumf %53, %54 : vector<8x1xf32>
      %56 = vector.broadcast %55 : vector<8x1xf32> to vector<8x128xf32>
      %57 = arith.divf %49, %56 : vector<8x128xf32>
      %c0_42 = arith.constant 0 : index
      %c0_43 = arith.constant 0 : index
      %58 = vector.load %arg9[%c0_42, %c0_43] : memref<8x128xf32, #tpu.memory_space<vmem>>, vector<8x128xf32>
      tpu.vector_store %arg9[%c0_42, %c0_43], %57 {strides = array<i32>} : memref<8x128xf32, #tpu.memory_space<vmem>>, vector<8x128xf32>,
    } else {
    }
    return
  }
  func.func @transform_0(%arg0: i32, %arg1: i32) -> (i32, i32) {
    %c0_i32 = arith.constant 0 : i32
    return %arg0, %arg1 : i32, i32
  }
  func.func @transform_1(%arg0: i32, %arg1: i32) -> (i32, i32) {
    %c0_i32 = arith.constant 0 : i32
    return %arg0, %arg1 : i32, i32
  }
  func.func @transform_2(%arg0: i32, %arg1: i32) -> (i32, i32) {
    %c0_i32 = arith.constant 0 : i32
    return %arg0, %arg1 : i32, i32
  }
  func.func @transform_3(%arg0: i32, %arg1: i32) -> (i32, i32) {
    %c0_i32 = arith.constant 0 : i32
    %c0_i32_0 = arith.constant 0 : i32
    return %arg1, %c0_i32 : i32, i32
  }
  func.func @transform_4(%arg0: i32, %arg1: i32) -> (i32, i32) {
    %c0_i32 = arith.constant 0 : i32
    %c0_i32_0 = arith.constant 0 : i32
    %c0_i32_1 = arith.constant 0 : i32
    return %c0_i32, %c0_i32_0 : i32, i32
  }
  func.func @transform_5(%arg0: i32, %arg1: i32) -> (i32, i32) {
    %c0_i32 = arith.constant 0 : i32
    %c0_i32_0 = arith.constant 0 : i32
    return %arg0, %c0_i32 : i32, i32
  }
  func.func @transform_6(%arg0: i32, %arg1: i32) -> (i32, i32) {
    %c0_i32 = arith.constant 0 : i32
    %c0_i32_0 = arith.constant 0 : i32
    return %arg0, %c0_i32 : i32, i32
  }
  func.func @transform_7(%arg0: i32, %arg1: i32) -> (i32, i32) {
    %c0_i32 = arith.constant 0 : i32
    %c0_i32_0 = arith.constant 0 : i32
    return %arg0, %c0_i32 : i32, i32
  }
}

</mosaic_0001>

<bundles_post_ra>
// kernel: tpu_custom_call.1
= control target key start
LH: loop header
LB: loop body
LE: loop exit
PB: predicated region body
PF: predicated region fallthrough
CT: control target
= control target key end

     0   :  { %13 = vsyncpa [#allocation3], 0  ;;  %s730_s0 = inlined_call_operand.hbm [shape: f32[8,32], index: 0, kind: input, shape index: {}]   ;;  %s731_s1 = inlined_call_operand.hbm [shape: f32[8,32], index: 1, kind: input, shape index: {}]   ;;  %s732_s2 = inlined_call_operand.hbm [shape: f32[8,32], index: 2, kind: input, shape index: {}]   ;;  %s733_s3 = inlined_call_operand.hbm [shape: f32[32,128], index: 3, kind: input, shape index: {}]   ;;  %s734_s4 = inlined_call_operand.vmem [shape: f32[1,128], index: 4, kind: input, shape index: {}]   ;;  %s735_s5 = inlined_call_operand.hbm [shape: f32[8,128], index: 5, kind: output, shape index: {0}]   ;;  %s736_s6 = inlined_call_operand.hbm [shape: f32[8,128], index: 6, kind: output, shape index: {1}]   ;;  %s737_s7 = inlined_call_operand.hbm [shape: f32[8,128], index: 7, kind: output, shape index: {2}]  }
   0x1   :  { %14 = vsyncpa [#allocation6], 0 }
   0x2   :  { %15 = vsyncpa [#allocation9], 0 }
   0x3   :  { %16 = vsyncpa [#allocation4], 0 }
   0x4   :  { %17 = vsyncpa [#allocation12], 0  ;;  %s644_s24 = smov [#allocation5]   ;;  %s645_s26 = smov [#allocation2]  }
   0x5   :  { %s34_s25 = sshll.u32 %s644_s24, 4  ;;  %s24_s27 = sshll.u32 %s645_s26, 4  ;;  %s35_s25 = int_to_ptr.vmem [resolvable:$true] %s34_s25  ;;  %s25_s27 = int_to_ptr.vmem [resolvable:$true] %s24_s27 }
   0x6   :  { %s502_s28 = scalar_lea.vmem %s35_s25, 128  ;;  %p507_p1 = scmp.lt.s32.totalorder %s35_s25, %s35_s25 }
   0x7   :  { %p503_p0 = scmp.ne.s32.totalorder %s35_s25, %s502_s28  ;;  %p508_p2 = scmp.lt.s32.totalorder %s502_s28, %s502_s28 }
   0x9   :  { %p509_p3 = por %p508_p2, %p507_p1 }
   0xb   :  { %p510_p4 = pnand %p509_p3, %p503_p0 }
   0xd   :  { %513 = shalt.err (!%p510_p4)
}
   0xe   :  { %37 = dma.hbm_to_vmem [thread:$0]  %s731_s1, 128, %s35_s25, [#allocation6]  }
   0xf   :  { %s522_s8 = scalar_lea.vmem %s25_s27, 128  ;;  %p527_p6 = scmp.lt.s32.totalorder %s25_s27, %s25_s27 }
  0x10   :  { %p523_p5 = scmp.ne.s32.totalorder %s25_s27, %s522_s8  ;;  %p528_p7 = scmp.lt.s32.totalorder %s522_s8, %s522_s8 }
  0x12   :  { %p529_p8 = por %p528_p7, %p527_p6 }
  0x14   :  { %p530_p9 = pnand %p529_p8, %p523_p5 }
  0x16   :  { %533 = shalt.err (!%p530_p9)
}
  0x17   :  { %27 = dma.hbm_to_vmem [thread:$0]  %s730_s0, 128, %s25_s27, [#allocation3]  }
  0x18   :  { %s646_s11 = smov [#allocation7]   ;;  %s647_s13 = smov [#allocation8]  }
  0x19   :  { %s44_s12 = sshll.u32 %s646_s11, 4  ;;  %s53_s14 = sshll.u32 %s647_s13, 4  ;;  %s45_s12 = int_to_ptr.vmem [resolvable:$true] %s44_s12  ;;  %s54_s14 = int_to_ptr.vmem [resolvable:$true] %s53_s14 }
  0x1a   :  { %s542_s15 = scalar_lea.vmem %s45_s12, 128  ;;  %p547_p11 = scmp.lt.s32.totalorder %s45_s12, %s45_s12 }
  0x1b   :  { %p543_p10 = scmp.ne.s32.totalorder %s45_s12, %s542_s15  ;;  %p548_p12 = scmp.lt.s32.totalorder %s542_s15, %s542_s15 }
  0x1d   :  { %p549_p13 = por %p548_p12, %p547_p11 }
  0x1f   :  { %p550_p0 = pnand %p549_p13, %p543_p10 }
  0x21   :  { %553 = shalt.err (!%p550_p0)
}
  0x22   :  { %47 = dma.hbm_to_vmem [thread:$0]  %s732_s2, 128, %s45_s12, [#allocation6]  }
  0x23   :  { %s562_s17 = scalar_lea.vmem %s54_s14, 512  ;;  %p567_p2 = scmp.lt.s32.totalorder %s54_s14, %s54_s14 }
  0x24   :  { %p563_p1 = scmp.ne.s32.totalorder %s54_s14, %s562_s17  ;;  %p568_p3 = scmp.lt.s32.totalorder %s562_s17, %s562_s17 }
  0x26   :  { %p569_p4 = por %p568_p3, %p567_p2 }
  0x28   :  { %p570_p5 = pnand %p569_p4, %p563_p1 }
  0x2a   :  { %573 = shalt.err (!%p570_p5)
}
  0x2b   :  { %s648_s0 = smov 128   ;;  %s649_s18 = smov 8  }
  0x2c   :  { %59 = dma.hbm_to_vmem [thread:$0]  %s733_s3, 512, %s54_s14, [#allocation9], %s648_s0, %s648_s0, %s649_s18  }
  0x2d   :  { %634 = dma.done.wait [#allocation3], 128  }
  0x2e   :  { %635 = vsyncadd [#allocation3], 4294967168 }
  0x2f   :  { %636 = dma.done.wait [#allocation6], 256  }
  0x30   :  { %637 = vsyncadd [#allocation6], 4294967040 }
  0x31   :  { %638 = dma.done.wait [#allocation9], 512  }
  0x32   :  { %639 = vsyncadd [#allocation9], 4294966784  ;;  %v650_v0 = vmov 0.0   ;;  %vm651_vm0 = vmmov 0   ;;  %v84_v1 = vld [vmem:[#allocation8 + $0x18] sm:$0xff]  ;;  %v83_v2 = vld [vmem:[#allocation8 + $0x10] sm:$0xff] }
  0x33   :  { %438 = vmatprep.subr.mxu0 %v650_v0  ;;  %449 = vmatprep.subr.mxu1 %v650_v0  ;;  %v82_v3 = vld [vmem:[#allocation8 + $0x8] sm:$0xff]  ;;  %v81_v4 = vld [vmem:[#allocation8] sm:$0xff]  ;;  %vm87_vm1 = vcmask 261120   ;;  %v164_v6 = vld [vmem:[#allocation5] sm:$0xff]  ;;  %s653_s22 = smov [#allocation10]  }
  0x34   :  { %446 = vmatprep.mubr.msk.f32.mxu0 %vm651_vm0, %v650_v0  ;;  %457 = vmatprep.mubr.msk.f32.mxu1 %vm651_vm0, %v650_v0  ;;  %v86_v5 = vld [vmem:[#allocation2] sm:$0xff]  ;;  %v241_v7 = vld [vmem:[#allocation7] sm:$0xff]  ;;  %s381_s23 = sshll.u32 %s653_s22, 4  ;;  %s382_s23 = int_to_ptr.vmem [resolvable:$true] %s381_s23 }
  0x35   :  { %439 = vmatpush3.msra.mxu0 %v84_v1  ;;  %450 = vmatpush3.msra.mxu1 %v84_v1  ;;  %v422_v10 = vld [vmem:[%s734_s4] ss:$0 sm:$0xff]  ;;  %s652_s4 = smov [#allocation11]  }
  0x36   :  { %440 = vmatprep.subr.mxu0 %v650_v0  ;;  %451 = vmatprep.subr.mxu1 %v650_v0  ;;  %s391_s21 = sshll.u32 %s652_s4, 4  ;;  %s392_s21 = int_to_ptr.vmem [resolvable:$true] %s391_s21 }
  0x37   :  { %441 = vmatpush3.msra.mxu0 %v83_v2  ;;  %452 = vmatpush3.msra.mxu1 %v83_v2  ;;  %s574_s24 = scalar_lea.vmem %s392_s21, 128  ;;  %p579_p7 = scmp.lt.s32.totalorder %s392_s21, %s392_s21 }
  0x38   :  { %442 = vmatprep.subr.mxu0 %v650_v0  ;;  %453 = vmatprep.subr.mxu1 %v650_v0  ;;  %p575_p6 = scmp.ne.s32.totalorder %s392_s21, %s574_s24  ;;  %p580_p8 = scmp.lt.s32.totalorder %s574_s24, %s574_s24 }
  0x39   :  { %443 = vmatpush3.msra.mxu0 %v82_v3  ;;  %454 = vmatpush3.msra.mxu1 %v82_v3 }
  0x3a   :  { %444 = vmatprep.subr.mxu0 %v650_v0  ;;  %455 = vmatprep.subr.mxu1 %v650_v0  ;;  %p581_p9 = por %p580_p8, %p579_p7 }
  0x3b   :  { %445 = vmatpush3.msra.mxu0 %v81_v4  ;;  %456 = vmatpush3.msra.mxu1 %v81_v4 }
  0x3c   :  { %447 = vmatmul.mubr.msk.f32.vlgmr.msra.gmra.mxu0 %vm87_vm1, %v86_v5  ;;  %458 = vmatmul.mubr.msk.f32.vlgmr.msra.gmra.mxu1 %vm87_vm1, %v164_v6  ;;  %p582_p10 = pnand %p581_p9, %p575_p6 }
  0x3d   :  { %460 = vmatprep.subr.mxu0 %v650_v0  ;;  %468 = vmatprep.mubr.msk.f32.mxu0 %vm651_vm0, %v650_v0 }
  0x3e   :  { %461 = vmatpush3.msra.mxu0 %v84_v1 }
  0x3f   :  { %462 = vmatprep.subr.mxu0 %v650_v0 }
  0x40   :  { %463 = vmatpush3.msra.mxu0 %v83_v2 }
  0x41   :  { %464 = vmatprep.subr.mxu0 %v650_v0 }
  0x42   :  { %465 = vmatpush3.msra.mxu0 %v82_v3 }
  0x43   :  { %466 = vmatprep.subr.mxu0 %v650_v0 }
  0x44   :  { %467 = vmatpush3.msra.mxu0 %v81_v4 }
  0x45   :  { %469 = vmatmul.mubr.msk.f32.vlgmr.msra.gmra.mxu0 %vm87_vm1, %v241_v7 }
  0xfc   :  { %v157_v8 = vpop.f32.mrf.mxu0  ;;  %v234_v9 = vpop.f32.mrf.mxu1 }
  0xfd   :  { %v344_v13 = vadd.f32 %v422_v10, %v234_v9  ;;  %v328_v15 = vadd.f32 %v422_v10, %v157_v8 }
  0xfe   :  { %v448_v11 = vpop.f32.mrf.mxu0  ;;  %v459_v12 = vpop.f32.mrf.mxu1 }
  0xff   :  { %v345_v14 = vmul.f32 %v344_v13, %v344_v13  ;;  %v329_v17 = vmul.f32 %v328_v15, %v328_v15 }
 0x101   :  { %346 = vadd.xlane.f32.xlu0 %v345_v14 }
 0x105   :  { %v311_v16 = vpop.f32.mrf.mxu0  ;;  %330 = vadd.xlane.f32.xlu0 %v329_v17 }
 0x106   :  { %v716_v19 = vadd.f32 %v422_v10, %v311_v16 }
 0x107   :  { %v470_v18 = vpop.f32.mrf.mxu0 }
 0x108   :  { %v361_v20 = vmul.f32 %v716_v19, %v716_v19 }
 0x10a   :  { %362 = vadd.xlane.f32.xlu1 %v361_v20 }
 0x18a   :  { %v347_v21 = vpop.xlane.xlu0 %346 }
 0x18b   :  { %482 = vrsqrt.f32 %v347_v21  ;;  %vm350_vm2 = vcmp.eq.f32.partialorder %v347_v21, inf  ;;  %v353_v26 = vand.u32 2147483648, %v347_v21  ;;  %vm352_vm3 = vcmp.eq.f32.partialorder %v347_v21, 0.0 }
 0x18e   :  { %v331_v22 = vpop.xlane.xlu0 %330 }
 0x18f   :  { %484 = vrsqrt.f32 %v331_v22  ;;  %vm334_vm4 = vcmp.eq.f32.partialorder %v331_v22, inf  ;;  %v337_v32 = vand.u32 2147483648, %v331_v22  ;;  %vm336_vm5 = vcmp.eq.f32.partialorder %v331_v22, 0.0 }
 0x193   :  { %v363_v23 = vpop.xlane.xlu1 %362 }
 0x194   :  { %486 = vrsqrt.f32 %v363_v23  ;;  %vm366_vm6 = vcmp.eq.f32.partialorder %v363_v23, inf  ;;  %v369_v38 = vand.u32 2147483648, %v363_v23  ;;  %vm368_vm7 = vcmp.eq.f32.partialorder %v363_v23, 0.0 }
 0x198   :  { %v483_v24 = vpop.eup %482 }
 0x199   :  { %v349_v25 = vmul.f32 %v483_v24, %v347_v21 }
 0x19b   :  { %v351_v27 = vsel %vm350_vm2, %v347_v21, %v349_v25 }
 0x19c   :  { %v485_v28 = vpop.eup %484  ;;  %v354_v29 = vsel %vm352_vm3, %v353_v26, %v351_v27 }
 0x19d   :  { %v355_v30 = vmax.f32 %v354_v29, 1e-12  ;;  %v333_v31 = vmul.f32 %v485_v28, %v331_v22 }
 0x19f   :  { %488 = vrcp.f32 %v355_v30  ;;  %v335_v33 = vsel %vm334_vm4, %v331_v22, %v333_v31 }
 0x1a0   :  { %v338_v34 = vsel %vm336_vm5, %v337_v32, %v335_v33 }
 0x1a1   :  { %v487_v35 = vpop.eup %486  ;;  %v339_v36 = vmax.f32 %v338_v34, 1e-12 }
 0x1a2   :  { %v365_v37 = vmul.f32 %v487_v35, %v363_v23 }
 0x1a3   :  { %490 = vrcp.f32 %v339_v36 }
 0x1a4   :  { %v367_v39 = vsel %vm366_vm6, %v363_v23, %v365_v37 }
 0x1a5   :  { %v370_v40 = vsel %vm368_vm7, %v369_v38, %v367_v39 }
 0x1a6   :  { %v371_v41 = vmax.f32 %v370_v40, 1e-12 }
 0x1a8   :  { %492 = vrcp.f32 %v371_v41 }
 0x1ac   :  { %v489_v42 = vpop.eup %488 }
 0x1ad   :  { %v357_v43 = vmul.f32 %v489_v42, %v344_v13 }
 0x1af   :  { %358 = vst [vmem:[#allocation11] sm:$0xff] %v357_v43 }
 0x1b0   :  { %v491_v44 = vpop.eup %490 }
 0x1b1   :  { %585 = shalt.err (!%p582_p10)
}
 0x1b2   :  { %394 = dma.vmem_to_hbm [thread:$0]  %s392_s21, 128, %s736_s6, [#allocation12]   ;;  %v341_v45 = vmul.f32 %v491_v44, %v328_v15 }
 0x1b3   :  { %s654_s27 = smov [#allocation13]   ;;  %s594_s29 = scalar_lea.vmem %s382_s23, 128 }
 0x1b4   :  { %342 = vst [vmem:[#allocation10] sm:$0xff] %v341_v45  ;;  %s401_s28 = sshll.u32 %s654_s27, 4  ;;  %p595_p11 = scmp.ne.s32.totalorder %s382_s23, %s594_s29  ;;  %s402_s28 = int_to_ptr.vmem [resolvable:$true] %s401_s28 }
 0x1b5   :  { %p599_p12 = scmp.lt.s32.totalorder %s382_s23, %s382_s23  ;;  %p600_p13 = scmp.lt.s32.totalorder %s594_s29, %s594_s29 }
 0x1b7   :  { %p601_p0 = por %p600_p13, %p599_p12 }
 0x1b9   :  { %p602_p1 = pnand %p601_p0, %p595_p11 }
 0x1bb   :  { %605 = shalt.err (!%p602_p1)
}
 0x1bc   :  { %384 = dma.vmem_to_hbm [thread:$0]  %s382_s23, 128, %s735_s5, [#allocation4]   ;;  %v493_v46 = vpop.eup %492 }
 0x1bd   :  { %v373_v47 = vmul.f32 %v493_v46, %v716_v19  ;;  %s614_s6 = scalar_lea.vmem %s402_s28, 128  ;;  %p619_p3 = scmp.lt.s32.totalorder %s402_s28, %s402_s28 }
 0x1be   :  { %p615_p2 = scmp.ne.s32.totalorder %s402_s28, %s614_s6  ;;  %p620_p4 = scmp.lt.s32.totalorder %s614_s6, %s614_s6 }
 0x1bf   :  { %374 = vst [vmem:[#allocation13] sm:$0xff] %v373_v47 }
 0x1c0   :  { %p621_p5 = por %p620_p4, %p619_p3 }
 0x1c2   :  { %p622_p6 = pnand %p621_p5, %p615_p2 }
 0x1c4   :  { %625 = shalt.err (!%p622_p6)
}
 0x1c5   :  { %404 = dma.vmem_to_hbm [thread:$0]  %s402_s28, 128, %s737_s7, [#allocation12]  }
 0x1c6   :  { %640 = dma.done.wait [#allocation4], 128  }
 0x1c7   :  { %641 = vsyncadd [#allocation4], 4294967168 }
 0x1c8   :  { %642 = dma.done.wait [#allocation12], 256  }
 0x1c9   :  { %643 = vsyncadd [#allocation12], 4294967040 }
 0x1ca   :  { %414 = vsyncpa [#allocation3], 1 }
 0x1cb   :  { %415 = vsyncpa [#allocation6], 1 }
 0x1cc   :  { %416 = vsyncpa [#allocation9], 1 }
 0x1cd   :  { %417 = vsyncpa [#allocation4], 1 }
 0x1ce   :  { %418 = vsyncpa [#allocation12], 1 }

</bundles_post_ra>
